<compile_context>
chip_gen: v7x
topology: tpu7x:2x2x1
jax: 0.10.0
libtpu: 0.0.40
codegen_flags: <defaults>
</compile_context>

<pallas_src>
import jax
import jax.numpy as jnp
from jax.experimental import pallas as pl
from jax.experimental.pallas import tpu as pltpu


def _round_up(x: int, m: int) -> int:
    return ((x + m - 1) // m) * m


# ---------------------------------------------------------------- kernels ----

def _conv1x1_kernel_nobias(x_ref, w_ref, o_ref):
    # x_ref: (tile, C_in), w_ref: (C_in, C_out_p), o_ref: (tile, C_out_p)
    o_ref[...] = jnp.dot(
        x_ref[...], w_ref[...], preferred_element_type=jnp.float32
    ).astype(o_ref.dtype)


def _conv1x1_kernel_bias(x_ref, w_ref, b_ref, o_ref):
    acc = jnp.dot(x_ref[...], w_ref[...], preferred_element_type=jnp.float32)
    acc = acc + b_ref[...].astype(jnp.float32)  # (1, C_out_p) broadcasts over rows
    o_ref[...] = acc.astype(o_ref.dtype)


# ---------------------------------------------------------------- wrapper ----

def prepare_conv1x1_params(weight: jax.Array, bias=None, *, lane_multiple: int = 128):
    """One-time parameter prep (hoist out of the per-call hot path):
    transpose (C_out, C_in) -> (C_in, C_out) and zero-pad C_out up to a
    lane-dense multiple of 128 so the kernel output uses unmasked stores."""
    c_out, c_in = weight.shape
    c_out_p = _round_up(c_out, lane_multiple)
    w_t = jnp.asarray(weight).T  # (C_in, C_out)
    if c_out_p != c_out:
        w_t = jnp.pad(w_t, ((0, 0), (0, c_out_p - c_out)))
    b2d = None
    if bias is not None:
        b = jnp.asarray(bias)
        if c_out_p != c_out:
            b = jnp.pad(b, (0, c_out_p - c_out))
        b2d = b.reshape(1, c_out_p)
    return w_t, b2d, c_out


def conv1x1_prepared(data: jax.Array, w_t: jax.Array, b2d, c_out: int,
                     *, tile_rows: int = 512):
    """data: (N, C_in); w_t: (C_in, C_out_p) pre-transposed / lane-padded;
    b2d: (1, C_out_p) or None; returns (N, c_out)."""
    n, c_in = data.shape
    c_in_w, c_out_p = w_t.shape
    assert c_in_w == c_in

    bytes_x = data.dtype.itemsize
    bytes_w = w_t.dtype.itemsize

    # Pick the largest row tile <= tile_rows whose double-buffered footprint
    # fits a conservative per-chip VMEM budget (v7x has only 64 MiB physical).
    vmem_budget = 24 << 20

    def footprint(t: int) -> int:
        io = 2 * t * (c_in + c_out_p) * bytes_x       # x + out, double-buffered
        wb = 2 * c_in * c_out_p * bytes_w             # weight (double-buffered)
        bb = (2 * c_out_p * bytes_w) if b2d is not None else 0
        return io + wb + bb

    tile = max(8, _round_up(min(tile_rows, _round_up(n, 8)), 8))
    while footprint(tile) > vmem_budget and tile > 8:
        tile = max(8, _round_up(tile // 2, 8))

    # Pad N so the grid is exact and the hot loop stays unmasked.
    n_p = _round_up(n, tile)
    x = data if n_p == n else jnp.pad(data, ((0, n_p - n), (0, 0)))

    grid = (n_p // tile,)
    x_spec = pl.BlockSpec((tile, c_in), lambda i: (i, 0))
    w_spec = pl.BlockSpec((c_in, c_out_p), lambda i: (0, 0))
    o_spec = pl.BlockSpec((tile, c_out_p), lambda i: (i, 0))
    out_shape = jax.ShapeDtypeStruct((n_p, c_out_p), data.dtype)

    cparams = pltpu.CompilerParams(
        dimension_semantics=("parallel",),  # row tiles shard across TCs (v7x)
        vmem_limit_bytes=min(max(2 * footprint(tile), 32 << 20), 48 << 20),
    )
    cost = pl.CostEstimate(
        flops=2 * n_p * c_in * c_out_p,
        transcendentals=0,
        bytes_accessed=(n_p * c_in + n_p * c_out_p) * bytes_x
                       + c_in * c_out_p * bytes_w,
    )

    if b2d is None:
        out = pl.pallas_call(
            _conv1x1_kernel_nobias,
            out_shape=out_shape,
            grid_spec=pltpu.PrefetchScalarGridSpec(
                num_scalar_prefetch=0, grid=grid,
                in_specs=[x_spec, w_spec], out_specs=o_spec),
            compiler_params=cparams,
            cost_estimate=cost,
        )(x, w_t)
    else:
        b_spec = pl.BlockSpec((1, c_out_p), lambda i: (0, 0))
        out = pl.pallas_call(
            _conv1x1_kernel_bias,
            out_shape=out_shape,
            grid_spec=pltpu.PrefetchScalarGridSpec(
                num_scalar_prefetch=0, grid=grid,
                in_specs=[x_spec, w_spec, b_spec], out_specs=o_spec),
            compiler_params=cparams,
            cost_estimate=cost,
        )(x, w_t, b2d)

    # Strip row padding and lane padding (glue, plain JAX).
    return out[:n, :c_out]


def conv1x1(data: jax.Array, weight: jax.Array, bias=None, *, tile_rows: int = 512):
    """Convenience one-shot API. For repeated inference, call
    prepare_conv1x1_params once at init and reuse conv1x1_prepared."""
    w_t, b2d, c_out = prepare_conv1x1_params(weight, bias)
    return conv1x1_prepared(data, w_t, b2d, c_out, tile_rows=tile_rows)

# TODO(synk): for very large C_in/C_out (thousands), add K/C_out tiling with a
# VMEM f32 accumulator (pl.when init/finalize) instead of streaming the full
# weight per grid step.


# ------------------------------------------------------------------- main ----

if __name__ == "__main__":
    # Small deterministic setup consistent with the module:
    # octree features (N, C_in) with N=64 nodes, in_channels=32, out_channels=16.
    key = jax.random.PRNGKey(0)
    k_x, k_w, k_b = jax.random.split(key, 3)

    N, C_IN, C_OUT = 64, 32, 16
    x = jax.random.normal(k_x, (N, C_IN), dtype=jnp.float32)
    # PyTorch Linear weight layout: (out_channels, in_channels)
    weight = jax.random.normal(k_w, (C_OUT, C_IN), dtype=jnp.float32) * 0.1
    bias = jax.random.normal(k_b, (C_OUT,), dtype=jnp.float32) * 0.1

    # Module default: use_bias=False
    w_t, b2d_none, c_out = prepare_conv1x1_params(weight, None)
    out = jax.block_until_ready(conv1x1_prepared(x, w_t, b2d_none, c_out))
    ref = x @ weight.T
    assert out.shape == (N, C_OUT)
    assert jnp.allclose(out, ref, atol=1e-5, rtol=1e-5), "no-bias mismatch"

    # Also exercise the use_bias=True path of the module.
    w_t_b, b2d, c_out_b = prepare_conv1x1_params(weight, bias)
    out_b = jax.block_until_ready(conv1x1_prepared(x, w_t_b, b2d, c_out_b))
    ref_b = x @ weight.T + bias[None, :]
    assert out_b.shape == (N, C_OUT)
    assert jnp.allclose(out_b, ref_b, atol=1e-5, rtol=1e-5), "bias mismatch"

    print("KERNEL_OK")
</pallas_src>

<mosaic_0001>
module attributes {stable_mosaic.version = 11 : i64} {
  func.func @_conv1x1_kernel_nobias(%arg0: i32, %arg1: memref<64x32xf32, #tpu.memory_space<vmem>>, %arg2: memref<32x128xf32, #tpu.memory_space<vmem>>, %arg3: memref<64x128xf32, #tpu.memory_space<vmem>>) attributes {dimension_semantics = [#tpu.dimension_semantics<parallel>], iteration_bounds = array<i64: 1>, scalar_prefetch = 0 : i64, scratch_operands = 0 : i64, tpu.core_type = #tpu.core_type<tc>, window_params = [{transform_indices = @transform_0, window_bounds = array<i64: 64, 32>}, {pipeline_mode = #tpu.pipeline_mode<synchronous>, transform_indices = @transform_1, window_bounds = array<i64: 32, 128>}, {transform_indices = @transform_2, window_bounds = array<i64: 64, 128>}]} {
    %c0 = arith.constant 0 : index
    %c0_0 = arith.constant 0 : index
    %0 = vector.load %arg1[%c0, %c0_0] : memref<64x32xf32, #tpu.memory_space<vmem>>, vector<64x32xf32>
    %c0_1 = arith.constant 0 : index
    %c0_2 = arith.constant 0 : index
    %1 = vector.load %arg2[%c0_1, %c0_2] : memref<32x128xf32, #tpu.memory_space<vmem>>, vector<32x128xf32>
    %cst = arith.constant dense<0.000000e+00> : vector<64x128xf32>
    %2 = tpu.matmul %0, %1, %cst {dimension_numbers = #tpu.dot_dimension_numbers<[1], [0], [0], [1], [0, 0, 1, 1], [], []>} : vector<64x32xf32>, vector<32x128xf32>, vector<64x128xf32> -> vector<64x128xf32>
    %c0_3 = arith.constant 0 : index
    %c0_4 = arith.constant 0 : index
    %3 = vector.load %arg3[%c0_3, %c0_4] : memref<64x128xf32, #tpu.memory_space<vmem>>, vector<64x128xf32>
    tpu.vector_store %arg3[%c0_3, %c0_4], %2 {strides = array<i32>} : memref<64x128xf32, #tpu.memory_space<vmem>>, vector<64x128xf32>,
    return
  }
  func.func @transform_0(%arg0: i32) -> (i32, i32) {
    %c0_i32 = arith.constant 0 : i32
    %c0_i32_0 = arith.constant 0 : i32
    return %arg0, %c0_i32 : i32, i32
  }
  func.func @transform_1(%arg0: i32) -> (i32, i32) {
    %c0_i32 = arith.constant 0 : i32
    %c0_i32_0 = arith.constant 0 : i32
    %c0_i32_1 = arith.constant 0 : i32
    return %c0_i32, %c0_i32_0 : i32, i32
  }
  func.func @transform_2(%arg0: i32) -> (i32, i32) {
    %c0_i32 = arith.constant 0 : i32
    %c0_i32_0 = arith.constant 0 : i32
    return %arg0, %c0_i32 : i32, i32
  }
}

</mosaic_0001>

<bundles_post_ra>
// kernel: tpu_custom_call.1
= control target key start
LH: loop header
LB: loop body
LE: loop exit
PB: predicated region body
PF: predicated region fallthrough
CT: control target
= control target key end

     0   :  { %vm24_vm0 = vcmask 261120   ;;  %s331_s0 = inlined_call_operand.vmem [shape: f32[64,32], index: 0, kind: input, shape index: {}]   ;;  %s332_s1 = inlined_call_operand.vmem [shape: f32[32,128], index: 1, kind: input, shape index: {}]   ;;  %s333_s2 = inlined_call_operand.hbm [shape: f32[64,128], index: 2, kind: output, shape index: {}]  }
   0x1   :  { %v20_v0 = vld [vmem:[%s332_s1] sm:$0xff]  ;;  %v21_v1 = vld [vmem:[%s332_s1 + $0x8] sm:$0xff]  ;;  %v22_v2 = vld [vmem:[%s332_s1 + $0x10] sm:$0xff] }
   0x2   :  { %v218_v3 = vpack.c.bf16 %v21_v1, %v20_v0  ;;  %v23_v4 = vld [vmem:[%s332_s1 + $0x18] sm:$0xff]  ;;  %v12_v5 = vld [vmem:[%s331_s0] sm:$0xff] }
   0x3   :  { %v16_v6 = vld [vmem:[%s331_s0 + $0x20] sm:$0xff]  ;;  %v222_v7 = vpack.c.bf16 %v23_v4, %v22_v2  ;;  %206 = vmatprep.mubr.msk.f32.mxu0 %vm24_vm0, %v12_v5 }
   0x4   :  { %212 = vmatprep.mubr.msk.f32.mxu1 %vm24_vm0, %v16_v6  ;;  %219 = vmatprep.subr.bf16.mxu0 %v218_v3 }
   0x5   :  { %226 = vmatprep.subr.bf16.mxu1 %v218_v3  ;;  %221 = vmatpush3.bf16.msra.mxu0 %v218_v3 }
   0x6   :  { %228 = vmatpush3.bf16.msra.mxu1 %v218_v3 }
   0x7   :  { %7 = vsyncpa [#allocation3], 0  ;;  %223 = vmatprep.subr.bf16.mxu0 %v222_v7  ;;  %227 = vmatprep.subr.bf16.mxu1 %v222_v7  ;;  %v13_v8 = vld [vmem:[%s331_s0 + $0x8] sm:$0xff]  ;;  %v14_v10 = vld [vmem:[%s331_s0 + $0x10] sm:$0xff]  ;;  %s257_s4 = smov [#allocation2]  }
   0x8   :  { %v17_v9 = vld [vmem:[%s331_s0 + $0x28] sm:$0xff]  ;;  %v18_v11 = vld [vmem:[%s331_s0 + $0x30] sm:$0xff]  ;;  %v15_v12 = vld [vmem:[%s331_s0 + $0x18] sm:$0xff]  ;;  %s167_s5 = sshll.u32 %s257_s4, 4  ;;  %s168_s5 = int_to_ptr.vmem [resolvable:$true] %s167_s5 }
   0x9   :  { %225 = vmatpush3.bf16.msra.mxu0 %v222_v7  ;;  %v19_v13 = vld [vmem:[%s331_s0 + $0x38] sm:$0xff]  ;;  %s233_s0 = scalar_lea.vmem %s168_s5, 1024  ;;  %p238_p1 = scmp.lt.s32.totalorder %s168_s5, %s168_s5 }
   0xa   :  { %229 = vmatpush3.bf16.msra.mxu1 %v222_v7  ;;  %p234_p0 = scmp.ne.s32.totalorder %s168_s5, %s233_s0  ;;  %p239_p2 = scmp.lt.s32.totalorder %s233_s0, %s233_s0 }
   0xc   :  { %207 = vmatmul.mubr.msk.f32.vlgmr.msra.gmra.mrb[0].mxu0 %vm24_vm0, %v13_v8  ;;  %p240_p3 = por %p239_p2, %p238_p1 }
   0xd   :  { %213 = vmatmul.mubr.msk.f32.vlgmr.msra.gmra.mrb[0].mxu1 %vm24_vm0, %v17_v9  ;;  %209 = vmatprep.mubr.msk.f32.mxu0 %vm24_vm0, %v14_v10 }
   0xe   :  { %215 = vmatprep.mubr.msk.f32.mxu1 %vm24_vm0, %v18_v11  ;;  %p241_p4 = pnand %p240_p3, %p234_p0 }
  0x10   :  { %210 = vmatmul.mubr.msk.f32.gmra.mrb[2].mxu0 %vm24_vm0, %v15_v12 }
  0x11   :  { %216 = vmatmul.mubr.msk.f32.gmra.mrb[2].mxu1 %vm24_vm0, %v19_v13 }
  0xdf   :  { %v208_v14 = vpop.f32.mrb[0].mxu0 }
  0xe0   :  { %v214_v15 = vpop.f32.mrb[0].mxu1  ;;  %155 = vst [vmem:[#allocation2 + $0x8] sm:$0xff] %v208_v14  ;;  %v115_v16 = vpop.f32.mrb[1].mxu0 }
  0xe1   :  { %159 = vst [vmem:[#allocation2 + $0x28] sm:$0xff] %v214_v15  ;;  %v135_v17 = vpop.f32.mrb[1].mxu1  ;;  %154 = vst [vmem:[#allocation2] sm:$0xff] %v115_v16 }
  0xe2   :  { %158 = vst [vmem:[#allocation2 + $0x20] sm:$0xff] %v135_v17 }
  0xe3   :  { %v211_v18 = vpop.f32.mrb[2].mxu0 }
  0xe4   :  { %v217_v19 = vpop.f32.mrb[2].mxu1  ;;  %157 = vst [vmem:[#allocation2 + $0x18] sm:$0xff] %v211_v18  ;;  %v125_v20 = vpop.f32.mrb[3].mxu0 }
  0xe5   :  { %161 = vst [vmem:[#allocation2 + $0x38] sm:$0xff] %v217_v19  ;;  %v145_v21 = vpop.f32.mrb[3].mxu1  ;;  %156 = vst [vmem:[#allocation2 + $0x10] sm:$0xff] %v125_v20 }
  0xe6   :  { %160 = vst [vmem:[#allocation2 + $0x30] sm:$0xff] %v145_v21 }
  0xe7   :  { %244 = shalt.err (!%p241_p4)
}
  0xe8   :  { %s245_s8 = scalar_lea.hbm %s333_s2, 1024 }
  0xe9   :  { %p246_p5 = scmp.ne.s32.totalorder %s333_s2, %s245_s8  ;;  %p249_p6 = scmp.lt.u32.totalorder %s245_s8, %s333_s2 }
  0xeb   :  { %p251_p7 = pnand %p249_p6, %p246_p5 }
  0xed   :  { %254 = shalt.err (!%p251_p7)
}
  0xee   :  { %s258_s13 = smov 128   ;;  %s259_s14 = smov 8  }
  0xef   :  { %173 = dma.vmem_to_hbm [thread:$0]  %s168_s5, 1024, %s333_s2, [#allocation3], %s258_s13, %s258_s13, %s259_s14  }
  0xf0   :  { %255 = dma.done.wait [#allocation3], 1024  }
  0xf1   :  { %256 = vsyncadd [#allocation3], 4294966272 }
  0xf2   :  { %177 = vsyncpa [#allocation3], 1 }

</bundles_post_ra>
